<compile_context>
chip_gen: v6e
topology: v6e:2x2x1
jax: 0.10.0
libtpu: 0.0.40
codegen_flags: <defaults>
</compile_context>

<pallas_src>
import jax
import jax.numpy as jnp
from jax.experimental import pallas as pl
from jax.experimental.pallas import tpu as pltpu


def _pick_batch_tile(n):
    """Largest batch tile in {8,4,2} dividing n that still leaves >=2 grid steps."""
    for b in (8, 4, 2):
        if n % b == 0 and n // b >= 2:
            return b
    if n >= 2:
        return 1
    return n


def ca_block(x, w1, bn_gamma, bn_beta, bn_mean, bn_var, wh, ww, eps=1e-5):
    N, C, H, W = x.shape
    Cr = w1.shape[0]
    L = H * W
    HpW = H + W
    B = _pick_batch_tile(N)

    # ---- fold eval-mode BatchNorm into the 1x1 conv weight (trace time) ----
    scale = bn_gamma / jnp.sqrt(bn_var + eps)                       # (Cr,)
    w1s = (w1 * scale[:, None]).astype(jnp.float32)                 # (Cr, C)
    shift = (bn_beta - bn_mean * scale).reshape(Cr, 1).astype(jnp.float32)

    # ---- constant pooling / broadcast matrices (lane-dense last dims) ----
    h_idx = jnp.arange(L) // W                                      # spatial h of flat pos
    w_idx = jnp.arange(L) % W                                       # spatial w of flat pos
    pool_h = (h_idx[:, None] == jnp.arange(H)[None, :]).astype(jnp.float32) / W   # (L, H)
    pool_w = (w_idx[:, None] == jnp.arange(W)[None, :]).astype(jnp.float32) / H   # (L, W)
    pool = jnp.concatenate([pool_h, pool_w], axis=1).astype(x.dtype)              # (L, H+W)
    bcast_h = (jnp.arange(H)[:, None] == h_idx[None, :]).astype(jnp.float32)      # (H, L)
    bcast_w = (jnp.arange(W)[:, None] == w_idx[None, :]).astype(jnp.float32)      # (W, L)

    x_flat = x.reshape(N, C, L)   # free reshape: NCHW is contiguous over (H, W)

    def kernel(x_ref, pool_ref, bh_ref, bw_ref, w1_ref, shift_ref,
               wh_ref, ww_ref, o_ref):
        p = pool_ref[...]         # (L, H+W)
        bh = bh_ref[...]          # (H, L)
        bw = bw_ref[...]          # (W, L)
        w1k = w1_ref[...]         # (Cr, C)   BN scale already folded in
        sh = shift_ref[...]       # (Cr, 1)
        whk = wh_ref[...]         # (C, Cr)
        wwk = ww_ref[...]         # (C, Cr)

        for b in range(B):                                            # static unroll
            xb = x_ref[b]                                              # (C, L), native dtype
            # both coordinate poolings in one matmul (f32 accumulation)
            pooled = jnp.dot(xb, p, preferred_element_type=jnp.float32)          # (C, H+W)
            # conv_1x1 (+ folded BN) + ReLU on the concatenated tensor
            y = jnp.dot(w1k, pooled, preferred_element_type=jnp.float32) + sh    # (Cr, H+W)
            y = jnp.maximum(y, 0.0)
            # F_h / F_w projections back to C channels + sigmoid gates
            s_h = jax.nn.sigmoid(
                jnp.dot(whk, y[:, :H], preferred_element_type=jnp.float32))      # (C, H)
            s_w = jax.nn.sigmoid(
                jnp.dot(wwk, y[:, H:], preferred_element_type=jnp.float32))      # (C, W)
            # broadcast gates to the lane-dense (C, L) layout via 0/1 matmuls
            gate = (jnp.dot(s_h, bh, preferred_element_type=jnp.float32)
                    * jnp.dot(s_w, bw, preferred_element_type=jnp.float32))      # (C, L)
            # elementwise epilogue in the input dtype
            o_ref[b] = xb * gate.astype(xb.dtype)

    def full_spec(shape):
        zeros = (0,) * len(shape)
        return pl.BlockSpec(shape, lambda n: zeros)

    itemsize = jnp.dtype(x.dtype).itemsize
    flops_per_img = (2 * C * L * HpW          # pooling matmul
                     + 2 * Cr * C * HpW       # conv_1x1
                     + 2 * C * Cr * HpW       # F_h + F_w
                     + 2 * C * HpW * L        # gate broadcast matmuls
                     + 3 * C * L)             # gate mul + x * gate
    cost = pl.CostEstimate(
        flops=N * flops_per_img,
        transcendentals=N * C * HpW,
        bytes_accessed=2 * N * C * L * itemsize,
    )

    out = pl.pallas_call(
        kernel,
        out_shape=jax.ShapeDtypeStruct((N, C, L), x.dtype),
        grid_spec=pltpu.PrefetchScalarGridSpec(
            num_scalar_prefetch=0,
            grid=(N // B,),
            in_specs=[
                pl.BlockSpec((B, C, L), lambda n: (n, 0, 0)),   # x tile (lane-dense)
                full_spec((L, HpW)),                            # pooling matrix
                full_spec((H, L)),                              # h-broadcast matrix
                full_spec((W, L)),                              # w-broadcast matrix
                full_spec((Cr, C)),                             # conv_1x1 weight (BN folded)
                full_spec((Cr, 1)),                             # BN shift
                full_spec((C, Cr)),                             # F_h weight
                full_spec((C, Cr)),                             # F_w weight
            ],
            out_specs=pl.BlockSpec((B, C, L), lambda n: (n, 0, 0)),
        ),
        compiler_params=pltpu.CompilerParams(dimension_semantics=("parallel",)),
        cost_estimate=cost,
    )(x_flat, pool, bcast_h, bcast_w, w1s, shift,
      wh.astype(jnp.float32), ww.astype(jnp.float32))

    return out.reshape(N, C, H, W)


def ca_block_ref(x, w1, gamma, beta, mean, var, wh, ww, eps=1e-5):
    """Pure-JAX reference mirroring the PyTorch forward (eval-mode BN)."""
    N, C, H, W = x.shape
    x_h = jnp.mean(x, axis=3)                                 # (N, C, H)
    x_w = jnp.mean(x, axis=2)                                 # (N, C, W)
    cat = jnp.concatenate([x_h, x_w], axis=2)                 # (N, C, H+W)
    y = jnp.einsum("rc,ncl->nrl", w1, cat)                    # conv_1x1
    y = (y - mean[None, :, None]) / jnp.sqrt(var[None, :, None] + eps)
    y = y * gamma[None, :, None] + beta[None, :, None]
    y = jnp.maximum(y, 0.0)
    yh, yw = y[:, :, :H], y[:, :, H:]
    s_h = jax.nn.sigmoid(jnp.einsum("cr,nrh->nch", wh, yh))   # (N, C, H)
    s_w = jax.nn.sigmoid(jnp.einsum("cr,nrw->ncw", ww, yw))   # (N, C, W)
    return x * s_h[:, :, :, None] * s_w[:, :, None, :]


if __name__ == "__main__":
    # Small, deterministic setup: channel=64, reduction=16 -> Cr=4.
    N, C, H, W = 2, 64, 16, 16
    reduction = 16
    Cr = C // reduction

    key = jax.random.PRNGKey(0)
    kx, k1, k2, k3, k4, k5, k6, k7 = jax.random.split(key, 8)

    x = jax.random.normal(kx, (N, C, H, W), dtype=jnp.float32)

    # Parameters (deterministic synthetic init).
    w1 = jax.random.normal(k1, (Cr, C), dtype=jnp.float32) * 0.1   # conv_1x1 (Cr, C, 1, 1) squeezed
    wh = jax.random.normal(k2, (C, Cr), dtype=jnp.float32) * 0.1   # F_h      (C, Cr, 1, 1) squeezed
    ww = jax.random.normal(k3, (C, Cr), dtype=jnp.float32) * 0.1   # F_w      (C, Cr, 1, 1) squeezed
    bn_gamma = 1.0 + 0.1 * jax.random.normal(k4, (Cr,), dtype=jnp.float32)
    bn_beta = 0.1 * jax.random.normal(k5, (Cr,), dtype=jnp.float32)
    bn_mean = 0.1 * jax.random.normal(k6, (Cr,), dtype=jnp.float32)
    bn_var = 1.0 + 0.1 * jax.random.uniform(k7, (Cr,), dtype=jnp.float32)

    out = ca_block(x, w1, bn_gamma, bn_beta, bn_mean, bn_var, wh, ww)
    out = jax.block_until_ready(out)

    ref = ca_block_ref(x, w1, bn_gamma, bn_beta, bn_mean, bn_var, wh, ww)
    ref = jax.block_until_ready(ref)

    assert out.shape == (N, C, H, W)
    assert jnp.allclose(out, ref, atol=1e-4, rtol=1e-4), "mismatch vs reference"

    print("KERNEL_OK")
</pallas_src>

<mosaic_0001>
module attributes {stable_mosaic.version = 11 : i64} {
  func.func @kernel(%arg0: i32, %arg1: memref<1x64x256xf32, #tpu.memory_space<vmem>>, %arg2: memref<256x32xf32, #tpu.memory_space<vmem>>, %arg3: memref<16x256xf32, #tpu.memory_space<vmem>>, %arg4: memref<16x256xf32, #tpu.memory_space<vmem>>, %arg5: memref<4x64xf32, #tpu.memory_space<vmem>>, %arg6: memref<4x1xf32, #tpu.memory_space<vmem>>, %arg7: memref<64x4xf32, #tpu.memory_space<vmem>>, %arg8: memref<64x4xf32, #tpu.memory_space<vmem>>, %arg9: memref<1x64x256xf32, #tpu.memory_space<vmem>>) attributes {dimension_semantics = [#tpu.dimension_semantics<parallel>], iteration_bounds = array<i64: 2>, scalar_prefetch = 0 : i64, scratch_operands = 0 : i64, tpu.core_type = #tpu.core_type<tc>, window_params = [{transform_indices = @transform_0, window_bounds = array<i64: 1, 64, 256>}, {pipeline_mode = #tpu.pipeline_mode<synchronous>, transform_indices = @transform_1, window_bounds = array<i64: 256, 32>}, {pipeline_mode = #tpu.pipeline_mode<synchronous>, transform_indices = @transform_2, window_bounds = array<i64: 16, 256>}, {pipeline_mode = #tpu.pipeline_mode<synchronous>, transform_indices = @transform_3, window_bounds = array<i64: 16, 256>}, {pipeline_mode = #tpu.pipeline_mode<synchronous>, transform_indices = @transform_4, window_bounds = array<i64: 4, 64>}, {pipeline_mode = #tpu.pipeline_mode<synchronous>, transform_indices = @transform_5, window_bounds = array<i64: 4, 1>}, {pipeline_mode = #tpu.pipeline_mode<synchronous>, transform_indices = @transform_6, window_bounds = array<i64: 64, 4>}, {pipeline_mode = #tpu.pipeline_mode<synchronous>, transform_indices = @transform_7, window_bounds = array<i64: 64, 4>}, {transform_indices = @transform_8, window_bounds = array<i64: 1, 64, 256>}]} {
    %c0 = arith.constant 0 : index
    %c0_0 = arith.constant 0 : index
    %0 = vector.load %arg2[%c0, %c0_0] : memref<256x32xf32, #tpu.memory_space<vmem>>, vector<256x32xf32>
    %c0_1 = arith.constant 0 : index
    %c0_2 = arith.constant 0 : index
    %1 = vector.load %arg3[%c0_1, %c0_2] : memref<16x256xf32, #tpu.memory_space<vmem>>, vector<16x256xf32>
    %c0_3 = arith.constant 0 : index
    %c0_4 = arith.constant 0 : index
    %2 = vector.load %arg4[%c0_3, %c0_4] : memref<16x256xf32, #tpu.memory_space<vmem>>, vector<16x256xf32>
    %c0_5 = arith.constant 0 : index
    %c0_6 = arith.constant 0 : index
    %3 = vector.load %arg5[%c0_5, %c0_6] : memref<4x64xf32, #tpu.memory_space<vmem>>, vector<4x64xf32>
    %c0_7 = arith.constant 0 : index
    %c0_8 = arith.constant 0 : index
    %4 = vector.load %arg6[%c0_7, %c0_8] : memref<4x1xf32, #tpu.memory_space<vmem>>, vector<4x1xf32>
    %c0_9 = arith.constant 0 : index
    %c0_10 = arith.constant 0 : index
    %5 = vector.load %arg7[%c0_9, %c0_10] : memref<64x4xf32, #tpu.memory_space<vmem>>, vector<64x4xf32>
    %c0_11 = arith.constant 0 : index
    %c0_12 = arith.constant 0 : index
    %6 = vector.load %arg8[%c0_11, %c0_12] : memref<64x4xf32, #tpu.memory_space<vmem>>, vector<64x4xf32>
    %c0_13 = arith.constant 0 : index
    %c0_14 = arith.constant 0 : index
    %c0_15 = arith.constant 0 : index
    %7 = vector.load %arg1[%c0_13, %c0_14, %c0_15] : memref<1x64x256xf32, #tpu.memory_space<vmem>>, vector<1x64x256xf32>
    %8 = vector.shape_cast %7 : vector<1x64x256xf32> to vector<64x256xf32>
    %cst = arith.constant dense<0.000000e+00> : vector<64x32xf32>
    %9 = tpu.matmul %8, %0, %cst {dimension_numbers = #tpu.dot_dimension_numbers<[1], [0], [0], [1], [0, 0, 1, 1], [], []>} : vector<64x256xf32>, vector<256x32xf32>, vector<64x32xf32> -> vector<64x32xf32>
    %cst_16 = arith.constant dense<0.000000e+00> : vector<4x32xf32>
    %10 = tpu.matmul %3, %9, %cst_16 {dimension_numbers = #tpu.dot_dimension_numbers<[1], [0], [0], [1], [0, 0, 1, 1], [], []>} : vector<4x64xf32>, vector<64x32xf32>, vector<4x32xf32> -> vector<4x32xf32>
    %11 = vector.broadcast %4 : vector<4x1xf32> to vector<4x32xf32>
    %12 = arith.addf %10, %11 : vector<4x32xf32>
    %cst_17 = arith.constant 0.000000e+00 : f32
    %13 = vector.broadcast %cst_17 : f32 to vector<4x32xf32>
    %14 = arith.maximumf %12, %13 : vector<4x32xf32>
    %15 = vector.extract_strided_slice %14 {offsets = [0, 0], sizes = [4, 16], strides = [1, 1]} : vector<4x32xf32> to vector<4x16xf32>
    %cst_18 = arith.constant dense<0.000000e+00> : vector<64x16xf32>
    %16 = tpu.matmul %5, %15, %cst_18 {dimension_numbers = #tpu.dot_dimension_numbers<[1], [0], [0], [1], [0, 0, 1, 1], [], []>} : vector<64x4xf32>, vector<4x16xf32>, vector<64x16xf32> -> vector<64x16xf32>
    %17 = arith.negf %16 : vector<64x16xf32>
    %18 = math.exp %17 : vector<64x16xf32>
    %cst_19 = arith.constant 1.000000e+00 : f32
    %19 = vector.broadcast %cst_19 : f32 to vector<64x16xf32>
    %20 = arith.addf %19, %18 : vector<64x16xf32>
    %21 = arith.divf %19, %20 : vector<64x16xf32>
    %22 = vector.extract_strided_slice %14 {offsets = [0, 16], sizes = [4, 16], strides = [1, 1]} : vector<4x32xf32> to vector<4x16xf32>
    %cst_20 = arith.constant dense<0.000000e+00> : vector<64x16xf32>
    %23 = tpu.matmul %6, %22, %cst_20 {dimension_numbers = #tpu.dot_dimension_numbers<[1], [0], [0], [1], [0, 0, 1, 1], [], []>} : vector<64x4xf32>, vector<4x16xf32>, vector<64x16xf32> -> vector<64x16xf32>
    %24 = arith.negf %23 : vector<64x16xf32>
    %25 = math.exp %24 : vector<64x16xf32>
    %cst_21 = arith.constant 1.000000e+00 : f32
    %26 = vector.broadcast %cst_21 : f32 to vector<64x16xf32>
    %27 = arith.addf %26, %25 : vector<64x16xf32>
    %28 = arith.divf %26, %27 : vector<64x16xf32>
    %cst_22 = arith.constant dense<0.000000e+00> : vector<64x256xf32>
    %29 = tpu.matmul %21, %1, %cst_22 {dimension_numbers = #tpu.dot_dimension_numbers<[1], [0], [0], [1], [0, 0, 1, 1], [], []>} : vector<64x16xf32>, vector<16x256xf32>, vector<64x256xf32> -> vector<64x256xf32>
    %cst_23 = arith.constant dense<0.000000e+00> : vector<64x256xf32>
    %30 = tpu.matmul %28, %2, %cst_23 {dimension_numbers = #tpu.dot_dimension_numbers<[1], [0], [0], [1], [0, 0, 1, 1], [], []>} : vector<64x16xf32>, vector<16x256xf32>, vector<64x256xf32> -> vector<64x256xf32>
    %31 = arith.mulf %29, %30 : vector<64x256xf32>
    %32 = arith.mulf %8, %31 : vector<64x256xf32>
    %c0_24 = arith.constant 0 : index
    %c0_25 = arith.constant 0 : index
    %c0_26 = arith.constant 0 : index
    %33 = vector.load %arg9[%c0_24, %c0_25, %c0_26] : memref<1x64x256xf32, #tpu.memory_space<vmem>>, vector<1x64x256xf32>
    %34 = vector.shape_cast %33 : vector<1x64x256xf32> to vector<64x256xf32>
    %35 = vector.shape_cast %32 : vector<64x256xf32> to vector<1x64x256xf32>
    tpu.vector_store %arg9[%c0_24, %c0_25, %c0_26], %35 {strides = array<i32>} : memref<1x64x256xf32, #tpu.memory_space<vmem>>, vector<1x64x256xf32>,
    return
  }
  func.func @transform_0(%arg0: i32) -> (i32, i32, i32) {
    %c0_i32 = arith.constant 0 : i32
    %c0_i32_0 = arith.constant 0 : i32
    %c0_i32_1 = arith.constant 0 : i32
    return %arg0, %c0_i32, %c0_i32_0 : i32, i32, i32
  }
  func.func @transform_1(%arg0: i32) -> (i32, i32) {
    %c0_i32 = arith.constant 0 : i32
    %c0_i32_0 = arith.constant 0 : i32
    %c0_i32_1 = arith.constant 0 : i32
    return %c0_i32, %c0_i32_0 : i32, i32
  }
  func.func @transform_2(%arg0: i32) -> (i32, i32) {
    %c0_i32 = arith.constant 0 : i32
    %c0_i32_0 = arith.constant 0 : i32
    %c0_i32_1 = arith.constant 0 : i32
    return %c0_i32, %c0_i32_0 : i32, i32
  }
  func.func @transform_3(%arg0: i32) -> (i32, i32) {
    %c0_i32 = arith.constant 0 : i32
    %c0_i32_0 = arith.constant 0 : i32
    %c0_i32_1 = arith.constant 0 : i32
    return %c0_i32, %c0_i32_0 : i32, i32
  }
  func.func @transform_4(%arg0: i32) -> (i32, i32) {
    %c0_i32 = arith.constant 0 : i32
    %c0_i32_0 = arith.constant 0 : i32
    %c0_i32_1 = arith.constant 0 : i32
    return %c0_i32, %c0_i32_0 : i32, i32
  }
  func.func @transform_5(%arg0: i32) -> (i32, i32) {
    %c0_i32 = arith.constant 0 : i32
    %c0_i32_0 = arith.constant 0 : i32
    %c0_i32_1 = arith.constant 0 : i32
    return %c0_i32, %c0_i32_0 : i32, i32
  }
  func.func @transform_6(%arg0: i32) -> (i32, i32) {
    %c0_i32 = arith.constant 0 : i32
    %c0_i32_0 = arith.constant 0 : i32
    %c0_i32_1 = arith.constant 0 : i32
    return %c0_i32, %c0_i32_0 : i32, i32
  }
  func.func @transform_7(%arg0: i32) -> (i32, i32) {
    %c0_i32 = arith.constant 0 : i32
    %c0_i32_0 = arith.constant 0 : i32
    %c0_i32_1 = arith.constant 0 : i32
    return %c0_i32, %c0_i32_0 : i32, i32
  }
  func.func @transform_8(%arg0: i32) -> (i32, i32, i32) {
    %c0_i32 = arith.constant 0 : i32
    %c0_i32_0 = arith.constant 0 : i32
    %c0_i32_1 = arith.constant 0 : i32
    return %arg0, %c0_i32, %c0_i32_0 : i32, i32, i32
  }
}

</mosaic_0001>

<bundles_post_ra>
// kernel: tpu_custom_call.1
= control target key start
LH: loop header
LB: loop body
LE: loop exit
PB: predicated region body
PF: predicated region fallthrough
CT: control target
= control target key end

     0   :  { %13 = vsyncpa [#allocation3], 0  ;;  %s2193_s0 = inlined_call_operand.vmem [shape: f32[2,64,256], index: 0, kind: input, shape index: {}]   ;;  %s2194_s1 = inlined_call_operand.vmem [shape: f32[256,32], index: 1, kind: input, shape index: {}]   ;;  %s2195_s2 = inlined_call_operand.vmem [shape: f32[16,256], index: 2, kind: input, shape index: {}]   ;;  %s2196_s3 = inlined_call_operand.vmem [shape: f32[16,256], index: 3, kind: input, shape index: {}]   ;;  %s2197_s4 = inlined_call_operand.vmem [shape: f32[4,64], index: 4, kind: input, shape index: {}]   ;;  %s2198_s5 = inlined_call_operand.vmem [shape: f32[4,1], index: 5, kind: input, shape index: {}]   ;;  %s2199_s6 = inlined_call_operand.vmem [shape: f32[64,4], index: 6, kind: input, shape index: {}]   ;;  %s2200_s7 = inlined_call_operand.vmem [shape: f32[64,4], index: 7, kind: input, shape index: {}]   ;;  %s2201_s8 = inlined_call_operand.hbm [shape: f32[2,64,256], index: 8, kind: output, shape index: {}]  }
   0x1   :  { %15 = vsyncpa [#allocation3 + $0x1], 0  ;;  %s1748_s27 = smov 0   ;;  %s1750_s28 = smov 0  }
   0x2   :  { %s1752_s29 = smov 0   ;;  %s1754_s30 = smov 0  }
   0x3 LB: > { %s1769_s9 = sadd.s32 4294967295, %s1694_s30   ;;  %s1325_s10 = sadd.s32 4294967294, %s1694_s30   ;;  %s1694_s30 = sphi %s1754_s30, %s2207_s30   ;;  %s1690_s29 = sphi %s1752_s29, %s2206_s29   ;;  %s1686_s28 = sphi %s1750_s28, %s2205_s28   ;;  %s1682_s27 = sphi %s1748_s27, %s2204_s27  }
   0x4   : > { %s1773_s11 = sadd.s32 1, %s1694_s30   ;;  %s201_s12 = sadd.s32 1, %s1690_s29 }
   0x5   : > { %s198_s13 = ssub.s32 %s1694_s30, %s1773_s11  ;;  %p211_p0 = scmp.ne.s32.totalorder %s1690_s29, %s1686_s28 }
   0x6   : > { %p199_p1 = scmp.eq.s32.totalorder %s198_s13, 0  ;;  %p212_p2 = scmp.eq.s32.totalorder %s1769_s9, 1 }
   0x7   : > { %p217_p3 = scmp.ne.s32.totalorder %s1686_s28, %s1682_s27  ;;  %p218_p4 = scmp.eq.s32.totalorder %s1325_s10, 1 }
   0x8   : > { %s1784_s14 = scalar_select %p199_p1, %s1690_s29, %s201_s12  }
   0x9   : > { %p1786_p5 = por %p212_p2, %p211_p0  ;;  %p1790_p6 = por %p218_p4, %p217_p3 }
   0xa   : > { %p1328_p7 = scmp.ge.s32.totalorder %s1694_s30, 1  ;;  %p265_p8 = scmp.lt.s32.totalorder %s1694_s30, 3 }
   0xc   : > { %p266_p9 = pnand %p1328_p7, %p265_p8 }
   0xd   : > { %p299_p10 = scmp.lt.s32.totalorder (!%p266_p9), %s1769_s9, 1  ;;  %s1699_s20 = smov (!%p266_p9), 112  }
   0xe   : > { %269 = sbr.rel (%p266_p9) target bundleno = 1070 (0x42e), region = 52  ;;  %s296_s25 = sand.u32 (!%p266_p9), 1, %s1686_s28  }
   0xf   : > { %s1389_s12 = sshll.u32 (!%p266_p9), %s1769_s9, 11  ;;  %s1700_s22 = smov (!%p266_p9), [#allocation2]  }
  0x13   : > { %v335_v0 = vld [vmem:[%s2194_s1 + $0xf8] sm:$0xff]  ;;  %v334_v2 = vld [vmem:[%s2194_s1 + $0xf0] sm:$0xff]  ;;  %v333_v4 = vld [vmem:[%s2194_s1 + $0xe8] sm:$0xff]  ;;  %s300_s10 = scalar_select %p299_p10, %s1769_s9, 1  ;;  %v1696_v48 = vmov 0.0   ;;  %vm1697_vm0 = vmmov 0  }
  0x14   : > { %v319_v1 = vld [vmem:[%s2194_s1 + $0x78] sm:$0xff]  ;;  %1390 = vmatprep.subr.mxu0 %v335_v0  ;;  %v318_v3 = vld [vmem:[%s2194_s1 + $0x70] sm:$0xff]  ;;  %v317_v5 = vld [vmem:[%s2194_s1 + $0x68] sm:$0xff]  ;;  %1473 = vmatprep.subr.mxu1 %v1696_v48  ;;  %v1698_v50 = vmov 0   ;;  %vm488_vm1 = vcmask 523264   ;;  %vm563_vm2 = vcmask 31744  }
  0x15   : > { %1391 = vmatpush3.msra.mxu0 %v319_v1  ;;  %v332_v6 = vld [vmem:[%s2194_s1 + $0xe0] sm:$0xff]  ;;  %s1388_s19 = sshll.u32 %s300_s10, 7  ;;  %v331_v8 = vld [vmem:[%s2194_s1 + $0xd8] sm:$0xff]  ;;  %v330_v10 = vld [vmem:[%s2194_s1 + $0xd0] sm:$0xff]  ;;  %1489 = vmatprep.mubr.msk.f32.mxu1 %vm1697_vm0, %v1696_v48  ;;  %vm588_vm3 = vcmask 1043456   ;;  %vm926_vm4 = vcmask 130048  }
  0x16   : > { %1392 = vmatprep.subr.mxu0 %v334_v2  ;;  %v316_v7 = vld [vmem:[%s2194_s1 + $0x60] sm:$0xff]  ;;  %v315_v9 = vld [vmem:[%s2194_s1 + $0x58] sm:$0xff]  ;;  %s1831_s13 = scalar_lea.vmem %s2193_s0, %s1388_s19  ;;  %v314_v11 = vld [vmem:[%s2194_s1 + $0x50] sm:$0xff]  ;;  %1569 = vset.pattern.permute.xlu0 %v1698_v50  ;;  %s2153_s9 = scalar_lea.sflag [#allocation3], %s296_s25 }
  0x17   : > { %1393 = vmatpush3.msra.mxu0 %v318_v3  ;;  %v329_v12 = vld [vmem:[%s2194_s1 + $0xc8] sm:$0xff]  ;;  %v328_v15 = vld [vmem:[%s2194_s1 + $0xc0] sm:$0xff]  ;;  %v327_v17 = vld [vmem:[%s2194_s1 + $0xb8] sm:$0xff]  ;;  %s1638_s19 = sshll.u32 %s1700_s22, 4  ;;  %s1639_s19 = int_to_ptr.vmem [resolvable:$false] %s1638_s19 }
  0x18   : > { %1394 = vmatprep.subr.mxu0 %v333_v4  ;;  %v1843_v13 = vld [vmem:[%s1831_s13 + $0x8] sm:$0xff]  ;;  %v312_v16 = vld [vmem:[%s2194_s1 + $0x40] sm:$0xff]  ;;  %v311_v18 = vld [vmem:[%s2194_s1 + $0x38] sm:$0xff]  ;;  %s1640_s23 = scalar_lea.vmem %s1639_s19, 4096 }
  0x19   : > { %1395 = vmatpush3.msra.mxu0 %v317_v5  ;;  %v313_v14 = vld [vmem:[%s2194_s1 + $0x48] sm:$0xff]  ;;  %442 = vmatprep.mubr.f32.mxu0 %v1843_v13  ;;  %v326_v19 = vld [vmem:[%s2194_s1 + $0xb0] sm:$0xff]  ;;  %v324_v23 = vld [vmem:[%s2194_s1 + $0xa0] sm:$0xff] }
  0x1a   : > { %1396 = vmatprep.subr.mxu0 %v332_v6  ;;  %v310_v20 = vld [vmem:[%s2194_s1 + $0x30] sm:$0xff]  ;;  %v325_v21 = vld [vmem:[%s2194_s1 + $0xa8] sm:$0xff]  ;;  %v308_v24 = vld [vmem:[%s2194_s1 + $0x20] sm:$0xff] }
  0x1b   : > { %1397 = vmatpush3.msra.mxu0 %v316_v7  ;;  %v309_v22 = vld [vmem:[%s2194_s1 + $0x28] sm:$0xff]  ;;  %v323_v25 = vld [vmem:[%s2194_s1 + $0x98] sm:$0xff]  ;;  %v322_v27 = vld [vmem:[%s2194_s1 + $0x90] sm:$0xff] }
  0x1c   : > { %1398 = vmatprep.subr.mxu0 %v331_v8  ;;  %v307_v26 = vld [vmem:[%s2194_s1 + $0x18] sm:$0xff]  ;;  %v306_v28 = vld [vmem:[%s2194_s1 + $0x10] sm:$0xff]  ;;  %v321_v29 = vld [vmem:[%s2194_s1 + $0x88] sm:$0xff] }
  0x1d   : > { %1399 = vmatpush3.msra.mxu0 %v315_v9  ;;  %v305_v30 = vld [vmem:[%s2194_s1 + $0x8] sm:$0xff]  ;;  %v320_v31 = vld [vmem:[%s2194_s1 + $0x80] sm:$0xff]  ;;  %v1907_v34 = vld [vmem:[%s1831_s13 + $0x18] sm:$0xff] }
  0x1e   : > { %1400 = vmatprep.subr.mxu0 %v330_v10  ;;  %v304_v32 = vld [vmem:[%s2194_s1] sm:$0xff]  ;;  %v1912_v35 = vld [vmem:[%s1831_s13 + $0x10] sm:$0xff]  ;;  %v1915_v36 = vld [vmem:[%s1831_s13 + $0x28] sm:$0xff] }
  0x1f   : > { %1401 = vmatpush3.msra.mxu0 %v314_v11  ;;  %v1904_v33 = vld [vmem:[%s1831_s13] sm:$0xff]  ;;  %v1923_v38 = vld [vmem:[%s1831_s13 + $0x38] sm:$0xff]  ;;  %v1928_v39 = vld [vmem:[%s1831_s13 + $0x30] sm:$0xff] }
  0x20   : > { %1402 = vmatprep.subr.mxu0 %v329_v12  ;;  %v1920_v37 = vld [vmem:[%s1831_s13 + $0x20] sm:$0xff]  ;;  %v1931_v40 = vld [vmem:[%s1831_s13 + $0x48] sm:$0xff]  ;;  %v1939_v42 = vld [vmem:[%s1831_s13 + $0x58] sm:$0xff] }
  0x21   : > { %1403 = vmatpush3.msra.mxu0 %v313_v14  ;;  %v1936_v41 = vld [vmem:[%s1831_s13 + $0x40] sm:$0xff]  ;;  %v1944_v43 = vld [vmem:[%s1831_s13 + $0x50] sm:$0xff]  ;;  %v1947_v44 = vld [vmem:[%s1831_s13 + $0x68] sm:$0xff] }
  0x22   : > { %1404 = vmatprep.subr.mxu0 %v328_v15  ;;  %v1952_v45 = vld [vmem:[%s1831_s13 + $0x60] sm:$0xff]  ;;  %v1955_v46 = vld [vmem:[%s1831_s13 + $0x78] sm:$0xff]  ;;  %v1960_v47 = vld [vmem:[%s1831_s13 + $0x70] sm:$0xff]  ;;  %s1329_s13 = sshll.u32 %s296_s25, 7 }
  0x23   : > { %1405 = vmatpush3.msra.mxu0 %v312_v16  ;;  %v345_v49 = vld [vmem:[%s2198_s5] sm:$0xf]  ;;  %v361_v50 = vld [vmem:[%s2200_s7 + $0x38] sm:$0xff]  ;;  %s2108_s26 = scalar_lea.vmem [#allocation2], %s1329_s13 }
  0x24   : > { %1406 = vmatprep.subr.mxu0 %v327_v17  ;;  %485 = vperm.xlu0 %1569, %v345_v49   ;;  %v344_v11 = vld [vmem:[%s2197_s4] sm:$0xf]  ;;  %v360_v49 = vld [vmem:[%s2200_s7 + $0x30] sm:$0xff]  ;;  %s1263_s10 = sshll.u32 %s2108_s26, 4  ;;  %s2146_s10 = int_to_ptr.vmem [resolvable:$true] %s1263_s10 }
  0x25   : > { %1407 = vmatpush3.msra.mxu0 %v311_v18  ;;  %v346_v12 = vld [vmem:[%s2199_s6] sm:$0xff]  ;;  %s1634_s21 = scalar_lea.vmem %s2146_s10, 2048  ;;  %p1641_p0 = scmp.lt.s32.totalorder %s2146_s10, %s1639_s19 }
  0x26   : > { %1408 = vmatprep.subr.mxu0 %v326_v19  ;;  %v347_v19 = vld [vmem:[%s2199_s6 + $0x8] sm:$0xff]  ;;  %p1635_p11 = scmp.ne.s32.totalorder %s2146_s10, %s1634_s21  ;;  %p1642_p1 = scmp.lt.s32.totalorder %s1640_s23, %s1634_s21 }
  0x27   : > { %1409 = vmatpush3.msra.mxu0 %v310_v20  ;;  %v348_v20 = vld [vmem:[%s2199_s6 + $0x10] sm:$0xff] }
  0x28   : > { %1410 = vmatprep.subr.mxu0 %v325_v21  ;;  %v349_v21 = vld [vmem:[%s2199_s6 + $0x18] sm:$0xff]  ;;  %p1636_p12 = pnand %p1635_p11, %p1786_p5  ;;  %p1643_p2 = por %p1642_p1, %p1641_p0 }
  0x29   : > { %1411 = vmatpush3.msra.mxu0 %v309_v22  ;;  %v350_v22 = vld [vmem:[%s2199_s6 + $0x20] sm:$0xff] }
  0x2a   : > { %1412 = vmatprep.subr.mxu0 %v324_v23  ;;  %v351_v23 = vld [vmem:[%s2199_s6 + $0x28] sm:$0xff]  ;;  %p1637_p13 = pneg %p1636_p12 }
  0x2b   : > { %1413 = vmatpush3.msra.mxu0 %v308_v24  ;;  %v352_v24 = vld [vmem:[%s2199_s6 + $0x30] sm:$0xff] }
  0x2c   : > { %1414 = vmatprep.subr.mxu0 %v323_v25  ;;  %v353_v25 = vld [vmem:[%s2199_s6 + $0x38] sm:$0xff]  ;;  %p1644_p3 = pnand %p1643_p2, %p1637_p13 }
  0x2d   : > { %1415 = vmatpush3.msra.mxu0 %v307_v26  ;;  %v354_v26 = vld [vmem:[%s2200_s7] sm:$0xff] }
  0x2e   : > { %1416 = vmatprep.subr.mxu0 %v322_v27 }
  0x2f   : > { %1417 = vmatpush3.msra.mxu0 %v306_v28  ;;  %v355_v28 = vld [vmem:[%s2200_s7 + $0x8] sm:$0xff] }
  0x30   : > { %1418 = vmatprep.subr.mxu0 %v321_v29  ;;  %v356_v29 = vld [vmem:[%s2200_s7 + $0x10] sm:$0xff] }
  0x31   : > { %1419 = vmatpush3.msra.mxu0 %v305_v30  ;;  %v357_v30 = vld [vmem:[%s2200_s7 + $0x18] sm:$0xff] }
  0x32   : > { %1420 = vmatprep.subr.mxu0 %v320_v31  ;;  %v358_v31 = vld [vmem:[%s2200_s7 + $0x20] sm:$0xff] }
  0x33   : > { %1421 = vmatpush3.msra.mxu0 %v304_v32  ;;  %v359_v32 = vld [vmem:[%s2200_s7 + $0x28] sm:$0xff] }
  0x34   : > { %443 = vmatmul.mubr.f32.vlgmr.msra.gmra.mxu0 %v1904_v33 }
  0x35   : > { %447 = vmatprep.mubr.f32.mxu0 %v1907_v34 }
  0x38   : > { %448 = vmatmul.mubr.f32.gmra.mxu0 %v1912_v35 }
  0x39   : > { %452 = vmatprep.mubr.f32.mxu0 %v1915_v36 }
  0x3c   : > { %453 = vmatmul.mubr.f32.gmra.mxu0 %v1920_v37 }
  0x3d   : > { %457 = vmatprep.mubr.f32.mxu0 %v1923_v38 }
  0x40   : > { %458 = vmatmul.mubr.f32.gmra.mxu0 %v1928_v39 }
  0x41   : > { %462 = vmatprep.mubr.f32.mxu0 %v1931_v40 }
  0x44   : > { %463 = vmatmul.mubr.f32.gmra.mxu0 %v1936_v41 }
  0x45   : > { %467 = vmatprep.mubr.f32.mxu0 %v1939_v42 }
  0x48   : > { %468 = vmatmul.mubr.f32.gmra.mxu0 %v1944_v43 }
  0x49   : > { %472 = vmatprep.mubr.f32.mxu0 %v1947_v44 }
  0x4c   : > { %473 = vmatmul.mubr.f32.gmra.mxu0 %v1952_v45 }
  0x4d   : > { %477 = vmatprep.mubr.f32.mxu0 %v1955_v46 }
  0x50   : > { %478 = vmatmul.mubr.f32.gmra.mxu0 %v1960_v47 }
  0x51   : > { %1152 = vmatprep.mubr.f32.mxu0 %v1696_v48 }
  0x9f   : > { %v486_v14 = vpop.permute.xlu0 %485 }
  0xf4   : > { %v1422_v51 = vpop.f32.mrf.mxu0 }
  0xf6   : > { %v1423_v52 = vpop.f32.mrf.mxu0 }
  0xf7   : > { %v1424_v10 = vadd.f32 %v1423_v52, %v1422_v51  ;;  %v339_v51 = vld [vmem:[%s2195_s2 + $0x18] sm:$0xff]  ;;  %v338_v52 = vld [vmem:[%s2195_s2 + $0x10] sm:$0xff] }
  0xf8   : > { %v1425_v53 = vpop.f32.mrf.mxu0 }
  0xfa   : > { %v1426_v54 = vpop.f32.mrf.mxu0 }
  0xfb   : > { %v1427_v9 = vadd.f32 %v1426_v54, %v1425_v53  ;;  %v337_v53 = vld [vmem:[%s2195_s2 + $0x8] sm:$0xff]  ;;  %v336_v54 = vld [vmem:[%s2195_s2] sm:$0xff] }
  0xfc   : > { %v1428_v55 = vpop.f32.mrf.mxu0 }
  0xfe   : > { %v1429_v56 = vpop.f32.mrf.mxu0 }
  0xff   : > { %v1430_v8 = vadd.f32 %v1429_v56, %v1428_v55 }
 0x100   : > { %v1431_v57 = vpop.f32.mrf.mxu0 }
 0x102   : > { %v1432_v58 = vpop.f32.mrf.mxu0 }
 0x103   : > { %v1433_v7 = vadd.f32 %v1432_v58, %v1431_v57 }
 0x104   : > { %v1434_v59 = vpop.f32.mrf.mxu0 }
 0x106   : > { %v1435_v60 = vpop.f32.mrf.mxu0 }
 0x107   : > { %v1436_v6 = vadd.f32 %v1435_v60, %v1434_v59 }
 0x108   : > { %v1437_v61 = vpop.f32.mrf.mxu0 }
 0x10a   : > { %v1438_v62 = vpop.f32.mrf.mxu0 }
 0x10b   : > { %v1439_v5 = vadd.f32 %v1438_v62, %v1437_v61 }
 0x10c   : > { %v1440_v63 = vpop.f32.mrf.mxu0 }
 0x10e   : > { %v1441_v0 = vpop.f32.mrf.mxu0 }
 0x10f   : > { %v1442_v4 = vadd.f32 %v1441_v0, %v1440_v63 }
 0x110   : > { %v1443_v1 = vpop.f32.mrf.mxu0 }
 0x112   : > { %v1444_v2 = vpop.f32.mrf.mxu0 }
 0x113   : > { %v1445_v3 = vadd.f32 %v1444_v2, %v1443_v1 }
 0x115   : > { %1474 = vmatpush3.msra.mxu1 %v1445_v3 }
 0x116   : > { %1475 = vmatprep.subr.mxu1 %v1696_v48 }
 0x117   : > { %1476 = vmatpush3.msra.mxu1 %v1442_v4 }
 0x118   : > { %1477 = vmatprep.subr.mxu1 %v1696_v48 }
 0x119   : > { %1478 = vmatpush3.msra.mxu1 %v1439_v5 }
 0x11a   : > { %1479 = vmatprep.subr.mxu1 %v1696_v48 }
 0x11b   : > { %1480 = vmatpush3.msra.mxu1 %v1436_v6  ;;  %v343_v6 = vld [vmem:[%s2196_s3 + $0x18] sm:$0xff] }
 0x11c   : > { %1481 = vmatprep.subr.mxu1 %v1696_v48  ;;  %1116 = vmatprep.subr.mxu0 %v343_v6 }
 0x11d   : > { %1482 = vmatpush3.msra.mxu1 %v1433_v7 }
 0x11e   : > { %1483 = vmatprep.subr.mxu1 %v1696_v48 }
 0x11f   : > { %1484 = vmatpush3.msra.mxu1 %v1430_v8 }
 0x120   : > { %1485 = vmatprep.subr.mxu1 %v1696_v48 }
 0x121   : > { %1486 = vmatpush3.msra.mxu1 %v1427_v9  ;;  %v342_v9 = vld [vmem:[%s2196_s3 + $0x10] sm:$0xff] }
 0x122   : > { %1487 = vmatprep.subr.mxu1 %v1696_v48  ;;  %1117 = vmatpush1.msra.mxu0 %v342_v9 }
 0x123   : > { %1488 = vmatpush3.msra.mxu1 %v1424_v10 }
 0x124   : > { %1490 = vmatmul.mubr.msk.f32.vlgmr.msra.gmra.mxu1 %vm488_vm1, %v344_v11 }
 0x125   : > { %1494 = vmatprep.mubr.msk.f32.mxu1 %vm563_vm2, %v346_v12  ;;  %v341_v12 = vld [vmem:[%s2196_s3 + $0x8] sm:$0xff] }
 0x126   : > { %1118 = vmatprep.subr.mxu0 %v341_v12 }
 0x1e4   : > { %v558_v15 = vpop.f32.mrf.mxu1 }
 0x1e5   : > { %v559_v16 = vadd.f32 %v558_v15, %v486_v14  ;;  %v340_v14 = vld [vmem:[%s2196_s3] sm:$0xff] }
 0x1e6   : > { %v1491_v17 = vpop.f32.mrf.mxu1  ;;  %1119 = vmatpush1.msra.mxu0 %v340_v14 }
 0x1e7   : > { %v562_v18 = vmax.f32 %v559_v16, 0.0 }
 0x1e9   : > { %745 = vrot.lane.b32.xlu0 %v562_v18, %s1699_s20  ;;  %1492 = vmatprep.subr.msk.mxu1 %vm588_vm3, %v562_v18  ;;  %s2144_s20 = scalar_lea.hbm %s2201_s8, %s1389_s12 }
 0x1ea   : > { %1493 = vmatpush3.msk.msra.mxu1 %vm588_vm3, %v562_v18 }
 0x1eb   : > { %1495 = vmatmul.mubr.msk.f32.vlgmr.msra.gmra.mxu1 %vm563_vm2, %v347_v19 }
 0x1ec   : > { %1497 = vmatprep.mubr.msk.f32.mxu1 %vm563_vm2, %v348_v20 }
 0x1ef   : > { %1498 = vmatmul.mubr.msk.f32.gmra.mxu1 %vm563_vm2, %v349_v21 }
 0x1f0   : > { %1500 = vmatprep.mubr.msk.f32.mxu1 %vm563_vm2, %v350_v22 }
 0x1f3   : > { %1501 = vmatmul.mubr.msk.f32.gmra.mxu1 %vm563_vm2, %v351_v23 }
 0x1f4   : > { %1503 = vmatprep.mubr.msk.f32.mxu1 %vm563_vm2, %v352_v24 }
 0x1f7   : > { %1504 = vmatmul.mubr.msk.f32.gmra.mxu1 %vm563_vm2, %v353_v25 }
 0x1f8   : > { %1508 = vmatprep.mubr.msk.f32.mxu1 %vm563_vm2, %v354_v26 }
 0x25b   : > { %v746_v27 = vpop.permute.xlu0 %745 }
 0x25c   : > { %1506 = vmatprep.subr.msk.mxu1 %vm588_vm3, %v746_v27 }
 0x25d   : > { %1507 = vmatpush3.msk.msra.mxu1 %vm588_vm3, %v746_v27 }
 0x25e   : > { %1509 = vmatmul.mubr.msk.f32.vlgmr.msra.gmra.mxu1 %vm563_vm2, %v355_v28  ;;  %979 = vmatprep.subr.mxu1 %v339_v51 }
 0x25f   : > { %1511 = vmatprep.mubr.msk.f32.mxu1 %vm563_vm2, %v356_v29  ;;  %980 = vmatpush1.msra.mxu1 %v338_v52 }
 0x260   : > { %981 = vmatprep.subr.mxu1 %v337_v53 }
 0x261   : > { %982 = vmatpush1.msra.mxu1 %v336_v54 }
 0x262   : > { %1512 = vmatmul.mubr.msk.f32.gmra.mxu1 %vm563_vm2, %v357_v30  ;;  %1520 = vmatprep.subr.mxu1 %v343_v6 }
 0x263   : > { %1514 = vmatprep.mubr.msk.f32.mxu1 %vm563_vm2, %v358_v31 }
 0x266   : > { %1515 = vmatmul.mubr.msk.f32.gmra.mxu1 %vm563_vm2, %v359_v32 }
 0x267   : > { %1517 = vmatprep.mubr.msk.f32.mxu1 %vm563_vm2, %v360_v49 }
 0x26a   : > { %1518 = vmatmul.mubr.msk.f32.gmra.mxu1 %vm563_vm2, %v361_v50 }
 0x26b   : > { %1015 = vmatprep.mubr.f32.mxu1 %v1696_v48 }
 0x2ab   : > { %v1496_v55 = vpop.f32.mrf.mxu1 }
 0x2ac   : > { %v1343_v56 = vmul.f32 -1.442695, %v1496_v55 }
 0x2ad   : > { %v658_v57 = vpop.f32.mrf.mxu1 }
 0x2ae   : > { %1570 = vpow2.f32 %v1343_v56  ;;  %v1342_v58 = vmul.f32 -1.442695, %v658_v57 }
 0x2af   : > { %v1499_v59 = vpop.f32.mrf.mxu1 }
 0x2b0   : > { %1572 = vpow2.f32 %v1342_v58  ;;  %v1345_v61 = vmul.f32 -1.442695, %v1499_v59 }
 0x2b1   : > { %v668_v60 = vpop.f32.mrf.mxu1 }
 0x2b2   : > { %v1344_v62 = vmul.f32 -1.442695, %v668_v60 }
 0x2b3   : > { %v1502_v63 = vpop.f32.mrf.mxu1 }
 0x2b4   : > { %1574 = vpow2.f32 %v1344_v62  ;;  %v1347_v3 = vmul.f32 -1.442695, %v1502_v63 }
 0x2b5   : > { %v678_v0 = vpop.f32.mrf.mxu1  ;;  %1576 = vpow2.f32 %v1345_v61 }
 0x2b6   : > { %v1346_v1 = vmul.f32 -1.442695, %v678_v0 }
 0x2b7   : > { %v1505_v2 = vpop.f32.mrf.mxu1 }
 0x2b8   : > { %1578 = vpow2.f32 %v1346_v1  ;;  %v1349_v16 = vmul.f32 -1.442695, %v1505_v2 }
 0x2b9   : > { %v688_v4 = vpop.f32.mrf.mxu1  ;;  %1580 = vpow2.f32 %v1347_v3 }
 0x2ba   : > { %v1348_v8 = vmul.f32 -1.442695, %v688_v4 }
 0x2bb   : > { %v1571_v5 = vpop.eup %1570 }
 0x2bc   : > { %v722_v10 = vadd.f32 1.0, %v1571_v5 }
 0x2bd   : > { %v1573_v7 = vpop.eup %1572 }
 0x2be   : > { %v721_v11 = vadd.f32 1.0, %v1573_v7 }
 0x2c0   : > { %1582 = vrcp.f32 %v721_v11 }
 0x2c1   : > { %v1575_v15 = vpop.eup %1574  ;;  %1584 = vpow2.f32 %v1348_v8 }
 0x2c2   : > { %1586 = vrcp.f32 %v722_v10  ;;  %v723_v17 = vadd.f32 1.0, %v1575_v15  ;;  %v1577_v18 = vpop.eup %1576 }
 0x2c3   : > { %1588 = vpow2.f32 %v1349_v16  ;;  %v724_v19 = vadd.f32 1.0, %v1577_v18 }
 0x2c4   : > { %1590 = vrcp.f32 %v723_v17 }
 0x2c5   : > { %v1579_v20 = vpop.eup %1578  ;;  %1592 = vrcp.f32 %v724_v19 }
 0x2c6   : > { %v725_v21 = vadd.f32 1.0, %v1579_v20  ;;  %v1581_v22 = vpop.eup %1580 }
 0x2c7   : > { %v726_v25 = vadd.f32 1.0, %v1581_v22 }
 0x2c8   : > { %1594 = vrcp.f32 %v725_v21 }
 0x2c9   : > { %1596 = vrcp.f32 %v726_v25 }
 0x2cd   : > { %v1583_v23 = vpop.eup %1582 }
 0x2ce   : > { %v1585_v24 = vpop.eup %1584  ;;  %1367 = vmatmul.mubr.msk.f32.vlgmr.msra.gmra.mxu1 %vm926_vm4, %v1583_v23 }
 0x2cf   : > { %v1587_v26 = vpop.eup %1586  ;;  %1021 = vmatprep.mubr.f32.mxu1 %v1696_v48  ;;  %1522 = vmatpush1.msra.mxu1 %v342_v9  ;;  %v727_v28 = vadd.f32 1.0, %v1585_v24 }
 0x2d0   : > { %1521 = vmatprep.subr.mxu1 %v341_v12  ;;  %v1589_v27 = vpop.eup %1588 }
 0x2d1   : > { %1523 = vmatpush1.msra.mxu1 %v340_v14  ;;  %v1591_v29 = vpop.eup %1590  ;;  %v728_v30 = vadd.f32 1.0, %v1589_v27  ;;  %1598 = vrcp.f32 %v727_v28 }
 0x2d2   : > { %1368 = vmatmul.mubr.msk.f32.gmra.mxu1 %vm926_vm4, %v1587_v26  ;;  %v1593_v31 = vpop.eup %1592 }
 0x2d3   : > { %1027 = vmatprep.mubr.f32.mxu1 %v1696_v48  ;;  %1600 = vrcp.f32 %v728_v30 }
 0x2d5   : > { %v1595_v32 = vpop.eup %1594 }
 0x2d6   : > { %1369 = vmatmul.mubr.msk.f32.gmra.mxu1 %vm926_vm4, %v1591_v29  ;;  %v1597_v49 = vpop.eup %1596 }
 0x2d7   : > { %1033 = vmatprep.mubr.f32.mxu1 %v1696_v48 }
 0x2da   : > { %1370 = vmatmul.mubr.msk.f32.gmra.mxu1 %vm926_vm4, %v1593_v31 }
 0x2db   : > { %1039 = vmatprep.mubr.f32.mxu1 %v1696_v48 }
 0x2de   : > { %1371 = vmatmul.mubr.msk.f32.gmra.mxu1 %vm926_vm4, %v1595_v32  ;;  %v1599_v50 = vpop.eup %1598 }
 0x2df   : > { %1045 = vmatprep.mubr.f32.mxu1 %v1696_v48 }
 0x2e0   : > { %v1601_v51 = vpop.eup %1600 }
 0x2e2   : > { %1372 = vmatmul.mubr.msk.f32.gmra.mxu1 %vm926_vm4, %v1597_v49 }
 0x2e3   : > { %1051 = vmatprep.mubr.f32.mxu1 %v1696_v48 }
 0x2e6   : > { %1373 = vmatmul.mubr.msk.f32.gmra.mxu1 %vm926_vm4, %v1599_v50 }
 0x2e7   : > { %1057 = vmatprep.mubr.f32.mxu1 %v1696_v48 }
 0x2ea   : > { %1374 = vmatmul.mubr.msk.f32.gmra.mxu1 %vm926_vm4, %v1601_v51 }
 0x2eb   : > { %1194 = vmatprep.mubr.f32.mxu1 %v1696_v48 }
 0x31e   : > { %v1510_v52 = vpop.f32.mrf.mxu1 }
 0x31f   : > { %v1360_v53 = vmul.f32 -1.442695, %v1510_v52 }
 0x320   : > { %v839_v54 = vpop.f32.mrf.mxu1 }
 0x321   : > { %v1359_v55 = vmul.f32 -1.442695, %v839_v54  ;;  %1602 = vpow2.f32 %v1360_v53 }
 0x322   : > { %v1513_v56 = vpop.f32.mrf.mxu1 }
 0x323   : > { %1604 = vpow2.f32 %v1359_v55  ;;  %v1362_v60 = vmul.f32 -1.442695, %v1513_v56 }
 0x324   : > { %v849_v57 = vpop.f32.mrf.mxu1 }
 0x325   : > { %v1361_v58 = vmul.f32 -1.442695, %v849_v57 }
 0x326   : > { %v1516_v59 = vpop.f32.mrf.mxu1 }
 0x327   : > { %1606 = vpow2.f32 %v1361_v58  ;;  %v1364_v1 = vmul.f32 -1.442695, %v1516_v59 }
 0x328   : > { %v859_v61 = vpop.f32.mrf.mxu1  ;;  %1608 = vpow2.f32 %v1362_v60 }
 0x329   : > { %v1363_v63 = vmul.f32 -1.442695, %v859_v61 }
 0x32a   : > { %v1519_v62 = vpop.f32.mrf.mxu1 }
 0x32b   : > { %v1366_v0 = vmul.f32 -1.442695, %v1519_v62 }
 0x32c   : > { %v869_v3 = vpop.f32.mrf.mxu1 }
 0x32d   : > { %1610 = vpow2.f32 %v1366_v0  ;;  %v1365_v6 = vmul.f32 -1.442695, %v869_v3 }
 0x32e   : > { %v1603_v2 = vpop.eup %1602  ;;  %1612 = vpow2.f32 %v1363_v63 }
 0x32f   : > { %1614 = vpow2.f32 %v1364_v1  ;;  %v903_v7 = vadd.f32 1.0, %v1603_v2 }
 0x330   : > { %v1605_v4 = vpop.eup %1604 }
 0x331   : > { %v902_v5 = vadd.f32 1.0, %v1605_v4 }
 0x333   : > { %1616 = vrcp.f32 %v902_v5 }
 0x334   : > { %v1607_v8 = vpop.eup %1606  ;;  %1618 = vpow2.f32 %v1365_v6 }
 0x335   : > { %1620 = vrcp.f32 %v903_v7  ;;  %v904_v9 = vadd.f32 1.0, %v1607_v8  ;;  %v1609_v10 = vpop.eup %1608 }
 0x336   : > { %v905_v12 = vadd.f32 1.0, %v1609_v10 }
 0x337   : > { %1622 = vrcp.f32 %v904_v9 }
 0x33a   : > { %v1611_v11 = vpop.eup %1610 }
 0x33b   : > { %v909_v14 = vadd.f32 1.0, %v1611_v11  ;;  %v1613_v15 = vpop.eup %1612 }
 0x33c   : > { %v1615_v16 = vpop.eup %1614  ;;  %v906_v17 = vadd.f32 1.0, %v1613_v15 }
 0x33d   : > { %1624 = vrcp.f32 %v909_v14  ;;  %v907_v20 = vadd.f32 1.0, %v1615_v16 }
 0x33e   : > { %1626 = vrcp.f32 %v905_v12 }
 0x33f   : > { %1628 = vrcp.f32 %v906_v17 }
 0x340   : > { %v1617_v18 = vpop.eup %1616  ;;  %1630 = vrcp.f32 %v907_v20 }
 0x341   : > { %1375 = vmatmul.mubr.msk.f32.vlgmr.msra.gmra.mxu0 %vm926_vm4, %v1617_v18  ;;  %v1619_v19 = vpop.eup %1618 }
 0x342   : > { %1158 = vmatprep.mubr.f32.mxu0 %v1696_v48  ;;  %v1621_v21 = vpop.eup %1620  ;;  %v908_v22 = vadd.f32 1.0, %v1619_v19 }
 0x344   : > { %v1623_v23 = vpop.eup %1622  ;;  %1632 = vrcp.f32 %v908_v22 }
 0x345   : > { %1376 = vmatmul.mubr.msk.f32.gmra.mxu0 %vm926_vm4, %v1621_v21 }
 0x346   : > { %1164 = vmatprep.mubr.f32.mxu0 %v1696_v48 }
 0x349   : > { %1377 = vmatmul.mubr.msk.f32.gmra.mxu0 %vm926_vm4, %v1623_v23 }
 0x34a   : > { %v1625_v24 = vpop.eup %1624  ;;  %1170 = vmatprep.mubr.f32.mxu0 %v1696_v48 }
 0x34b   : > { %1382 = vmatmul.mubr.msk.f32.vlgmr.msra.gmra.mxu1 %vm926_vm4, %v1625_v24  ;;  %v1627_v25 = vpop.eup %1626 }
 0x34c   : > { %v1629_v26 = vpop.eup %1628 }
 0x34d   : > { %1378 = vmatmul.mubr.msk.f32.gmra.mxu0 %vm926_vm4, %v1627_v25  ;;  %v1631_v27 = vpop.eup %1630 }
 0x34e   : > { %1176 = vmatprep.mubr.f32.mxu0 %v1696_v48 }
 0x351   : > { %1379 = vmatmul.mubr.msk.f32.gmra.mxu0 %vm926_vm4, %v1629_v26  ;;  %v1633_v28 = vpop.eup %1632 }
 0x352   : > { %1182 = vmatprep.mubr.f32.mxu0 %v1696_v48 }
 0x355   : > { %1380 = vmatmul.mubr.msk.f32.gmra.mxu0 %vm926_vm4, %v1631_v27 }
 0x356   : > { %1188 = vmatprep.mubr.f32.mxu0 %v1696_v48 }
 0x359   : > { %1381 = vmatmul.mubr.msk.f32.gmra.mxu0 %vm926_vm4, %v1633_v28 }
 0x38e   : > { %v1017_v29 = vpop.f32.mrf.mxu1 }
 0x390   : > { %v1019_v30 = vpop.f32.mrf.mxu1 }
 0x392   : > { %v1023_v31 = vpop.f32.mrf.mxu1 }
 0x394   : > { %v1025_v32 = vpop.f32.mrf.mxu1 }
 0x396   : > { %v1029_v49 = vpop.f32.mrf.mxu1 }
 0x398   : > { %v1031_v50 = vpop.f32.mrf.mxu1 }
 0x39a   : > { %v1035_v51 = vpop.f32.mrf.mxu1 }
 0x39c   : > { %v1037_v52 = vpop.f32.mrf.mxu1 }
 0x39e   : > { %v1041_v53 = vpop.f32.mrf.mxu1 }
 0x3a0   : > { %v1043_v54 = vpop.f32.mrf.mxu1 }
 0x3a2   : > { %v1047_v55 = vpop.f32.mrf.mxu1 }
 0x3a4   : > { %v1049_v56 = vpop.f32.mrf.mxu1 }
 0x3a6   : > { %v1053_v57 = vpop.f32.mrf.mxu1 }
 0x3a8   : > { %v2105_v58 = vpop.f32.mrf.mxu1 }
 0x3aa   : > { %v1059_v0 = vpop.f32.mrf.mxu1 }
 0x401   : > { %v1154_v48 = vpop.f32.mrf.mxu0 }
 0x402   : > { %v1201_v59 = vmul.f32 %v1154_v48, %v1017_v29 }
 0x403   : > { %v1156_v60 = vpop.f32.mrf.mxu0 }
 0x404   : > { %v1217_v61 = vmul.f32 %v1201_v59, %v1904_v33  ;;  %v1202_v62 = vmul.f32 %v1156_v60, %v1019_v30  ;;  %v1061_v33 = vpop.f32.mrf.mxu1 }
 0x405   : > { %v1160_v63 = vpop.f32.mrf.mxu0 }
 0x406   : > { %1233 = vst [vmem:[%s2108_s26] sm:$0xff] %v1217_v61  ;;  %v1218_v1 = vmul.f32 %v1202_v62, %v1843_v13  ;;  %v1203_v2 = vmul.f32 %v1160_v63, %v1023_v31 }
 0x407   : > { %v1162_v3 = vpop.f32.mrf.mxu0 }
 0x408   : > { %1234 = vst [vmem:[%s2108_s26 + $0x8] sm:$0xff] %v1218_v1  ;;  %v1219_v4 = vmul.f32 %v1203_v2, %v1912_v35  ;;  %v1204_v5 = vmul.f32 %v1162_v3, %v1025_v32 }
 0x409   : > { %v1166_v6 = vpop.f32.mrf.mxu0 }
 0x40a   : > { %1235 = vst [vmem:[%s2108_s26 + $0x10] sm:$0xff] %v1219_v4  ;;  %v1220_v7 = vmul.f32 %v1204_v5, %v1907_v34  ;;  %v1205_v8 = vmul.f32 %v1166_v6, %v1029_v49 }
 0x40b   : > { %v1168_v9 = vpop.f32.mrf.mxu0  ;;  %v1196_v10 = vpop.f32.mrf.mxu1 }
 0x40c   : > { %1236 = vst [vmem:[%s2108_s26 + $0x18] sm:$0xff] %v1220_v7  ;;  %v1221_v13 = vmul.f32 %v1205_v8, %v1920_v37  ;;  %v1206_v11 = vmul.f32 %v1168_v9, %v1031_v50  ;;  %v1215_v12 = vmul.f32 %v1196_v10, %v1059_v0 }
 0x40d   : > { %v1172_v14 = vpop.f32.mrf.mxu0  ;;  %v1198_v35 = vpop.f32.mrf.mxu1 }
 0x40e   : > { %1237 = vst [vmem:[%s2108_s26 + $0x20] sm:$0xff] %v1221_v13  ;;  %v1222_v15 = vmul.f32 %v1206_v11, %v1915_v36  ;;  %v1231_v34 = vmul.f32 %v1215_v12, %v1960_v47  ;;  %v1207_v16 = vmul.f32 %v1172_v14, %v1035_v51  ;;  %v1216_v17 = vmul.f32 %v1198_v35, %v1061_v33 }
 0x40f   : > { %v1174_v18 = vpop.f32.mrf.mxu0 }
 0x410   : > { %1238 = vst [vmem:[%s2108_s26 + $0x28] sm:$0xff] %v1222_v15  ;;  %1247 = vst [vmem:[%s2108_s26 + $0x70] sm:$0xff] %v1231_v34  ;;  %v1223_v37 = vmul.f32 %v1207_v16, %v1928_v39  ;;  %v1232_v19 = vmul.f32 %v1216_v17, %v1955_v46  ;;  %v1208_v20 = vmul.f32 %v1174_v18, %v1037_v52 }
 0x411   : > { %v1178_v21 = vpop.f32.mrf.mxu0 }
 0x412   : > { %1239 = vst [vmem:[%s2108_s26 + $0x30] sm:$0xff] %v1223_v37  ;;  %1248 = vst [vmem:[%s2108_s26 + $0x78] sm:$0xff] %v1232_v19  ;;  %v1224_v36 = vmul.f32 %v1208_v20, %v1923_v38  ;;  %v1209_v22 = vmul.f32 %v1178_v21, %v1041_v53 }
 0x413   : > { %v1180_v47 = vpop.f32.mrf.mxu0 }
 0x414   : > { %1240 = vst [vmem:[%s2108_s26 + $0x38] sm:$0xff] %v1224_v36  ;;  %v1225_v23 = vmul.f32 %v1209_v22, %v1936_v41  ;;  %v1210_v24 = vmul.f32 %v1180_v47, %v1043_v54 }
 0x415   : > { %v1184_v39 = vpop.f32.mrf.mxu0 }
 0x416   : > { %1241 = vst [vmem:[%s2108_s26 + $0x40] sm:$0xff] %v1225_v23  ;;  %v1226_v46 = vmul.f32 %v1210_v24, %v1931_v40  ;;  %v1211_v25 = vmul.f32 %v1184_v39, %v1047_v55 }
 0x417   : > { %v1186_v26 = vpop.f32.mrf.mxu0 }
 0x418   : > { %1242 = vst [vmem:[%s2108_s26 + $0x48] sm:$0xff] %v1226_v46  ;;  %v1227_v27 = vmul.f32 %v1211_v25, %v1944_v43  ;;  %v1212_v38 = vmul.f32 %v1186_v26, %v1049_v56 }
 0x419   : > { %v1190_v28 = vpop.f32.mrf.mxu0 }
 0x41a   : > { %1243 = vst [vmem:[%s2108_s26 + $0x50] sm:$0xff] %v1227_v27  ;;  %v1228_v29 = vmul.f32 %v1212_v38, %v1939_v42  ;;  %v1213_v41 = vmul.f32 %v1190_v28, %v1053_v57 }
 0x41b   : > { %v1192_v30 = vpop.f32.mrf.mxu0 }
 0x41c   : > { %1244 = vst [vmem:[%s2108_s26 + $0x58] sm:$0xff] %v1228_v29  ;;  %v1229_v40 = vmul.f32 %v1213_v41, %v1952_v45  ;;  %v1214_v31 = vmul.f32 %v1192_v30, %v2105_v58 }
 0x41e   : > { %1245 = vst [vmem:[%s2108_s26 + $0x60] sm:$0xff] %v1229_v40  ;;  %v1230_v42 = vmul.f32 %v1214_v31, %v1947_v44 }
 0x420   : > { %1246 = vst [vmem:[%s2108_s26 + $0x68] sm:$0xff] %v1230_v42 }
 0x421   : > { %1647 = shalt.err (!%p1644_p3)
}
 0x422   : > { %s1648_s24 = scalar_lea.hbm %s2144_s20, 2048  ;;  %s1652_s26 = scalar_lea.hbm %s2201_s8, 4096 }
 0x423   : > { %p1649_p4 = scmp.ne.s32.totalorder %s2144_s20, %s1648_s24  ;;  %p1653_p9 = scmp.lt.s32.totalorder %s2144_s20, %s2201_s8 }
 0x424   : > { %p1654_p10 = scmp.lt.s32.totalorder %s1652_s26, %s1648_s24 }
 0x425   : > { %p1650_p7 = pnand %p1649_p4, %p1786_p5 }
 0x426   : > { %p1655_p11 = por %p1654_p10, %p1653_p9 }
 0x427   : > { %p1651_p8 = pneg %p1650_p7 }
 0x429   : > { %p1656_p12 = pnand %p1655_p11, %p1651_p8 }
 0x42b   : > { %1659 = shalt.err (!%p1656_p12)
}
 0x42c   : > { %s1701_s18 = smov 256   ;;  %s1702_s21 = smov 16  }
 0x42d   : > { %1524 = dma.vmem_to_hbm [thread:$0]  (%p1786_p5), %s2146_s10, 2048, %s2144_s20, %s2153_s9, %s1701_s18, %s1701_s18, %s1702_s21  }
 0x42e PF: > { %p1530_p13 = scmp.ge.s32.totalorder %s1694_s30, 2  ;;  %s1278_s22 = sand.u32 1, %s1682_s27  }
 0x42f   : > { %s1279_s19 = scalar_lea.sflag [#allocation3], %s1278_s22 }
 0x430   : > { %p1527_p0 = pnand %p1530_p13, %p1790_p6 }
 0x432   : > { %p1528_p1 = pneg %p1527_p0 }
 0x434   : > { %1677 = dma.done.wait (%p1528_p1), %s1279_s19, 2048  }
 0x435   : > { %1679 = vsyncadd (%p1528_p1), %s1279_s19, 4294965248  ;;  %p18_p2 = scmp.ge.s32.totalorder %s1773_s11, 4   ;;  %s2204_s27 = smov %s1686_s28 }
 0x436   : > { %s2205_s28 = smov %s1690_s29  ;;  %s2206_s29 = smov %s1784_s14 }
 0x437   : > { %s2207_s30 = smov %s1773_s11  ;;  %20 = sbr.rel (!%p18_p2) target bundleno = 3 (0x3), region = 87 }
 0x43c   :  { %1284 = vsyncpa [#allocation3], 1 }
 0x43d   :  { %1286 = vsyncpa [#allocation3 + $0x1], 1 }

</bundles_post_ra>
